<compile_context>
chip_gen: v7x
topology: tpu7x:2x2x1
jax: 0.10.0
libtpu: 0.0.40
codegen_flags: <defaults>
</compile_context>

<pallas_src>
import jax
import jax.numpy as jnp
from jax import lax
from jax.experimental import pallas as pl
from jax.experimental.pallas import tpu as pltpu

BN_EPS = 1e-5


# ----------------------------- kernel helpers (traced inside the kernel) ------

def _im2col_k3(x):
    # x: (TB, L, C). Returns (TB, L, 3C) = [x[t-1] | x[t] | x[t+1]] with zero
    # padding at the sequence boundaries (single padded buffer + static slices).
    tb, l, c = x.shape
    zero = jnp.zeros((tb, 1, c), x.dtype)
    xp = jnp.concatenate([zero, x, zero], axis=1)             # (TB, L+2, C)
    return jnp.concatenate(
        [xp[:, 0:l, :], xp[:, 1:l + 1, :], xp[:, 2:l + 2, :]], axis=-1)


def _conv_mm(x3, w_bf16, bias):
    # One fused conv layer: (TB*L, 3Cin) @ (3Cin, Cout) on the MXU in bf16 with
    # f32 accumulation, plus the (BN-)folded bias.
    tb, l, k = x3.shape
    y = jnp.dot(x3.reshape(tb * l, k).astype(jnp.bfloat16), w_bf16,
                preferred_element_type=jnp.float32)
    return y.reshape(tb, l, w_bf16.shape[-1]) + bias          # bias (1, Cout) broadcasts


# ----------------------------- Pallas kernel ----------------------------------

def cnn_kernel(x_ref, w1_ref, b1_ref, w2_ref, b2_ref,
               wsum_ref, wfirst_ref, wlast_ref, b3fc_ref, out_ref):
    x = x_ref[...]                                            # (TB, L, 20) f32

    # Conv1d(20 -> 64, k=3, p=1) + folded BN + ReLU
    h = jnp.maximum(_conv_mm(_im2col_k3(x), w1_ref[...], b1_ref[...]), 0.0)

    # Conv1d(64 -> 128, k=3, p=1) + folded BN + ReLU
    h = jnp.maximum(_conv_mm(_im2col_k3(h), w2_ref[...], b2_ref[...]), 0.0)

    # Conv1d(128 -> 128, k=3, p=1) + AdaptiveAvgPool1d(1) + Linear(128 -> 1),
    # with the mean-pool pushed through the conv taps:
    #   mean_t conv3(h)[t]·Wfc = [ S·(W0+W1+W2) - h[L-1]·W0 - h[0]·W2 ] / L,
    # 1/L already folded into wsum / wfirst / wlast by the wrapper.
    l = h.shape[1]
    s = jnp.sum(h, axis=1)                                    # (TB, 128)
    y = (jnp.sum(s * wsum_ref[...], axis=-1, keepdims=True)
         - jnp.sum(h[:, 0, :] * wfirst_ref[...], axis=-1, keepdims=True)
         - jnp.sum(h[:, l - 1, :] * wlast_ref[...], axis=-1, keepdims=True))
    out_ref[...] = (y + b3fc_ref[...]).astype(out_ref.dtype)


# ----------------------------- wrapper -----------------------------------------

def _fold_params(p, seq_len):
    f32 = jnp.float32

    def bn_fold(w, b, g, be, m, v):
        # w: (3, Cin, Cout); eval-mode BN folded into the conv.
        s = g * lax.rsqrt(v + BN_EPS)                         # (1, Cout)
        wf = w.reshape(-1, w.shape[-1]) * s                   # (3*Cin, Cout)
        bf = (b - m) * s + be                                 # (1, Cout)
        return wf.astype(jnp.bfloat16), bf.astype(f32)

    w1f, b1f = bn_fold(p["w1"], p["b1"], p["g1"], p["be1"], p["m1"], p["v1"])
    w2f, b2f = bn_fold(p["w2"], p["b2"], p["g2"], p["be2"], p["m2"], p["v2"])

    # conv3 ∘ mean-pool ∘ fc fold (linear chain, no nonlinearity in between),
    # with the mean over t pushed through the three conv taps.
    w3fc = (p["w3"] @ p["wfc"])[..., 0]                       # (3, 128): per-tap folded vectors
    w0, w1, w2 = w3fc[0], w3fc[1], w3fc[2]
    inv_l = 1.0 / float(seq_len)
    wsum = ((w0 + w1 + w2) * inv_l).reshape(1, -1).astype(f32)   # multiplies S = sum_t h[t]
    wfirst = (w2 * inv_l).reshape(1, -1).astype(f32)             # boundary correction at h[0]
    wlast = (w0 * inv_l).reshape(1, -1).astype(f32)              # boundary correction at h[L-1]
    b3fc = (p["b3"] @ p["wfc"] + p["bfc"]).astype(f32)           # (1, 1)
    return w1f, b1f, w2f, b2f, wsum, wfirst, wlast, b3fc


def cnn_forward(x, params):
    bsz, seq, feat = x.shape
    w1f, b1f, w2f, b2f, wsum, wfirst, wlast, b3fc = _fold_params(params, seq)

    # Batch tile: TB*L matmul rows per step (128 rows at TB=8, L=16) with a
    # small VMEM working set; the grid pipelines / parallelizes over batch.
    tb = bsz if bsz <= 8 else 8
    if bsz % tb != 0:
        tb = bsz                                              # fallback: single tile

    def full(arr):
        n = arr.ndim
        return pl.BlockSpec(arr.shape, lambda i, _n=n: (0,) * _n)

    return pl.pallas_call(
        cnn_kernel,
        out_shape=jax.ShapeDtypeStruct((bsz, 1), jnp.float32),
        grid=(bsz // tb,),
        in_specs=[
            pl.BlockSpec((tb, seq, feat), lambda i: (i, 0, 0)),
            full(w1f), full(b1f),
            full(w2f), full(b2f),
            full(wsum), full(wfirst), full(wlast), full(b3fc),
        ],
        out_specs=pl.BlockSpec((tb, 1), lambda i: (i, 0)),
        compiler_params=pltpu.CompilerParams(
            dimension_semantics=("parallel",)),
    )(x, w1f, b1f, w2f, b2f, wsum, wfirst, wlast, b3fc)


# ----------------------------- params & reference -----------------------------

def init_params(key):
    ks = jax.random.split(key, 16)
    f32 = jnp.float32

    def conv_w(k, cin, cout):
        # stored as (K=3, Cin, Cout) == transpose of torch's (Cout, Cin, K)
        return jax.random.normal(k, (3, cin, cout), f32) * 0.1

    p = {
        "w1": conv_w(ks[0], 20, 64),
        "b1": jax.random.normal(ks[1], (1, 64), f32) * 0.1,
        "g1": jax.random.uniform(ks[2], (1, 64), f32, 0.5, 1.5),
        "be1": jax.random.normal(ks[3], (1, 64), f32) * 0.1,
        "m1": jax.random.normal(ks[4], (1, 64), f32) * 0.1,
        "v1": jax.random.uniform(ks[5], (1, 64), f32, 0.5, 1.5),

        "w2": conv_w(ks[6], 64, 128),
        "b2": jax.random.normal(ks[7], (1, 128), f32) * 0.1,
        "g2": jax.random.uniform(ks[8], (1, 128), f32, 0.5, 1.5),
        "be2": jax.random.normal(ks[9], (1, 128), f32) * 0.1,
        "m2": jax.random.normal(ks[10], (1, 128), f32) * 0.1,
        "v2": jax.random.uniform(ks[11], (1, 128), f32, 0.5, 1.5),

        "w3": conv_w(ks[12], 128, 128),
        "b3": jax.random.normal(ks[13], (1, 128), f32) * 0.1,

        "wfc": jax.random.normal(ks[14], (128, 1), f32) * 0.1,
        "bfc": jax.random.normal(ks[15], (1, 1), f32) * 0.1,
    }
    return p


def reference_forward(x, p):
    # Independent pure-JAX reference mirroring the PyTorch NCL convolutions
    # (unfolded f32 params — validates the BN/pool/FC folding and im2col conv).
    h = jnp.transpose(x, (0, 2, 1))                           # (B, 20, L)

    def conv(h, w, b):
        w_t = jnp.transpose(w, (2, 1, 0))                     # (Cout, Cin, K)
        y = lax.conv_general_dilated(h, w_t, window_strides=(1,), padding=[(1, 1)],
                                     dimension_numbers=("NCH", "OIH", "NCH"))
        return y + b.reshape(1, -1, 1)

    def bn(h, g, be, m, v):
        g, be, m, v = (t.reshape(1, -1, 1) for t in (g, be, m, v))
        return (h - m) / jnp.sqrt(v + BN_EPS) * g + be

    h = jax.nn.relu(bn(conv(h, p["w1"], p["b1"]), p["g1"], p["be1"], p["m1"], p["v1"]))
    h = jax.nn.relu(bn(conv(h, p["w2"], p["b2"]), p["g2"], p["be2"], p["m2"], p["v2"]))
    h = conv(h, p["w3"], p["b3"])
    pooled = jnp.mean(h, axis=2)                              # AdaptiveAvgPool1d(1) + squeeze
    return pooled @ p["wfc"] + p["bfc"]


# ----------------------------- main --------------------------------------------

if __name__ == "__main__":
    key = jax.random.PRNGKey(0)
    k_x, k_p = jax.random.split(key)

    B, L, F = 2, 16, 20                                       # module requires 20 input features
    x = jax.random.normal(k_x, (B, L, F), jnp.float32)
    params = init_params(k_p)

    out = jax.block_until_ready(cnn_forward(x, params))
    ref = jax.block_until_ready(reference_forward(x, params))

    assert out.shape == (B, 1), out.shape
    # bf16 MXU operands -> relaxed tolerance vs. the f32 reference.
    if not jnp.allclose(out, ref, rtol=5e-2, atol=5e-2):
        raise AssertionError(f"mismatch: kernel={out} ref={ref}")

    print("KERNEL_OK")
</pallas_src>

<mosaic_0001>
module attributes {stable_mosaic.version = 11 : i64} {
  func.func @cnn_kernel(%arg0: i32, %arg1: memref<2x16x20xf32, #tpu.memory_space<vmem>>, %arg2: memref<60x64xbf16, #tpu.memory_space<vmem>>, %arg3: memref<1x64xf32, #tpu.memory_space<vmem>>, %arg4: memref<192x128xbf16, #tpu.memory_space<vmem>>, %arg5: memref<1x128xf32, #tpu.memory_space<vmem>>, %arg6: memref<1x128xf32, #tpu.memory_space<vmem>>, %arg7: memref<1x128xf32, #tpu.memory_space<vmem>>, %arg8: memref<1x128xf32, #tpu.memory_space<vmem>>, %arg9: memref<1x1xf32, #tpu.memory_space<vmem>>, %arg10: memref<2x1xf32, #tpu.memory_space<vmem>>) attributes {dimension_semantics = [#tpu.dimension_semantics<parallel>], iteration_bounds = array<i64: 1>, scalar_prefetch = 0 : i64, scratch_operands = 0 : i64, tpu.core_type = #tpu.core_type<tc>, window_params = [{transform_indices = @transform_0, window_bounds = array<i64: 2, 16, 20>}, {pipeline_mode = #tpu.pipeline_mode<synchronous>, transform_indices = @transform_1, window_bounds = array<i64: 60, 64>}, {pipeline_mode = #tpu.pipeline_mode<synchronous>, transform_indices = @transform_2, window_bounds = array<i64: 1, 64>}, {pipeline_mode = #tpu.pipeline_mode<synchronous>, transform_indices = @transform_3, window_bounds = array<i64: 192, 128>}, {pipeline_mode = #tpu.pipeline_mode<synchronous>, transform_indices = @transform_4, window_bounds = array<i64: 1, 128>}, {pipeline_mode = #tpu.pipeline_mode<synchronous>, transform_indices = @transform_5, window_bounds = array<i64: 1, 128>}, {pipeline_mode = #tpu.pipeline_mode<synchronous>, transform_indices = @transform_6, window_bounds = array<i64: 1, 128>}, {pipeline_mode = #tpu.pipeline_mode<synchronous>, transform_indices = @transform_7, window_bounds = array<i64: 1, 128>}, {pipeline_mode = #tpu.pipeline_mode<synchronous>, transform_indices = @transform_8, window_bounds = array<i64: 1, 1>}, {transform_indices = @transform_9, window_bounds = array<i64: 2, 1>}]} {
    %c0 = arith.constant 0 : index
    %c0_0 = arith.constant 0 : index
    %c0_1 = arith.constant 0 : index
    %0 = vector.load %arg1[%c0, %c0_0, %c0_1] : memref<2x16x20xf32, #tpu.memory_space<vmem>>, vector<2x16x20xf32>
    %cst = arith.constant 0.000000e+00 : f32
    %1 = vector.broadcast %cst : f32 to vector<2x1x20xf32>
    %2 = tpu.concatenate %1, %0, %1 in 1 : vector<2x1x20xf32>, vector<2x16x20xf32>, vector<2x1x20xf32> -> vector<2x18x20xf32>
    %3 = vector.extract_strided_slice %2 {offsets = [0, 0, 0], sizes = [2, 16, 20], strides = [1, 1, 1]} : vector<2x18x20xf32> to vector<2x16x20xf32>
    %4 = vector.extract_strided_slice %2 {offsets = [0, 1, 0], sizes = [2, 16, 20], strides = [1, 1, 1]} : vector<2x18x20xf32> to vector<2x16x20xf32>
    %5 = vector.extract_strided_slice %2 {offsets = [0, 2, 0], sizes = [2, 16, 20], strides = [1, 1, 1]} : vector<2x18x20xf32> to vector<2x16x20xf32>
    %6 = tpu.concatenate %3, %4, %5 in 2 : vector<2x16x20xf32>, vector<2x16x20xf32>, vector<2x16x20xf32> -> vector<2x16x60xf32>
    %c0_2 = arith.constant 0 : index
    %c0_3 = arith.constant 0 : index
    %7 = vector.load %arg2[%c0_2, %c0_3] : memref<60x64xbf16, #tpu.memory_space<vmem>>, vector<60x64xbf16>
    %c0_4 = arith.constant 0 : index
    %c0_5 = arith.constant 0 : index
    %8 = vector.load %arg3[%c0_4, %c0_5] : memref<1x64xf32, #tpu.memory_space<vmem>>, vector<1x64xf32>
    %9 = vector.shape_cast %6 : vector<2x16x60xf32> to vector<32x60xf32>
    %10 = arith.truncf %9 : vector<32x60xf32> to vector<32x60xbf16>
    %cst_6 = arith.constant dense<0.000000e+00> : vector<32x64xf32>
    %11 = tpu.matmul %10, %7, %cst_6 {dimension_numbers = #tpu.dot_dimension_numbers<[1], [0], [0], [1], [0, 0, 1, 1], [], []>} : vector<32x60xbf16>, vector<60x64xbf16>, vector<32x64xf32> -> vector<32x64xf32>
    %12 = vector.shape_cast %11 : vector<32x64xf32> to vector<2x16x64xf32>
    %13 = vector.shape_cast %8 : vector<1x64xf32> to vector<1x1x64xf32>
    %14 = vector.broadcast %13 : vector<1x1x64xf32> to vector<2x16x64xf32>
    %15 = arith.addf %12, %14 : vector<2x16x64xf32>
    %cst_7 = arith.constant 0.000000e+00 : f32
    %16 = vector.broadcast %cst_7 : f32 to vector<2x16x64xf32>
    %17 = arith.maximumf %15, %16 : vector<2x16x64xf32>
    %cst_8 = arith.constant 0.000000e+00 : f32
    %18 = vector.broadcast %cst_8 : f32 to vector<2x1x64xf32>
    %19 = tpu.concatenate %18, %17, %18 in 1 : vector<2x1x64xf32>, vector<2x16x64xf32>, vector<2x1x64xf32> -> vector<2x18x64xf32>
    %20 = vector.extract_strided_slice %19 {offsets = [0, 0, 0], sizes = [2, 16, 64], strides = [1, 1, 1]} : vector<2x18x64xf32> to vector<2x16x64xf32>
    %21 = vector.extract_strided_slice %19 {offsets = [0, 1, 0], sizes = [2, 16, 64], strides = [1, 1, 1]} : vector<2x18x64xf32> to vector<2x16x64xf32>
    %22 = vector.extract_strided_slice %19 {offsets = [0, 2, 0], sizes = [2, 16, 64], strides = [1, 1, 1]} : vector<2x18x64xf32> to vector<2x16x64xf32>
    %23 = tpu.concatenate %20, %21, %22 in 2 : vector<2x16x64xf32>, vector<2x16x64xf32>, vector<2x16x64xf32> -> vector<2x16x192xf32>
    %c0_9 = arith.constant 0 : index
    %c0_10 = arith.constant 0 : index
    %24 = vector.load %arg4[%c0_9, %c0_10] : memref<192x128xbf16, #tpu.memory_space<vmem>>, vector<192x128xbf16>
    %c0_11 = arith.constant 0 : index
    %c0_12 = arith.constant 0 : index
    %25 = vector.load %arg5[%c0_11, %c0_12] : memref<1x128xf32, #tpu.memory_space<vmem>>, vector<1x128xf32>
    %26 = vector.shape_cast %23 : vector<2x16x192xf32> to vector<32x192xf32>
    %27 = arith.truncf %26 : vector<32x192xf32> to vector<32x192xbf16>
    %cst_13 = arith.constant dense<0.000000e+00> : vector<32x128xf32>
    %28 = tpu.matmul %27, %24, %cst_13 {dimension_numbers = #tpu.dot_dimension_numbers<[1], [0], [0], [1], [0, 0, 1, 1], [], []>} : vector<32x192xbf16>, vector<192x128xbf16>, vector<32x128xf32> -> vector<32x128xf32>
    %29 = vector.shape_cast %28 : vector<32x128xf32> to vector<2x16x128xf32>
    %30 = vector.shape_cast %25 : vector<1x128xf32> to vector<1x1x128xf32>
    %31 = vector.broadcast %30 : vector<1x1x128xf32> to vector<2x16x128xf32>
    %32 = arith.addf %29, %31 : vector<2x16x128xf32>
    %cst_14 = arith.constant 0.000000e+00 : f32
    %33 = vector.broadcast %cst_14 : f32 to vector<2x16x128xf32>
    %34 = arith.maximumf %32, %33 : vector<2x16x128xf32>
    %cst_15 = arith.constant dense<0.000000e+00> : vector<2x128xf32>
    %35 = vector.multi_reduction <add>, %34, %cst_15 [1] : vector<2x16x128xf32> to vector<2x128xf32>
    %c0_16 = arith.constant 0 : index
    %c0_17 = arith.constant 0 : index
    %36 = vector.load %arg6[%c0_16, %c0_17] : memref<1x128xf32, #tpu.memory_space<vmem>>, vector<1x128xf32>
    %37 = vector.broadcast %36 : vector<1x128xf32> to vector<2x128xf32>
    %38 = arith.mulf %35, %37 : vector<2x128xf32>
    %cst_18 = arith.constant dense<0.000000e+00> : vector<2xf32>
    %39 = vector.multi_reduction <add>, %38, %cst_18 [1] : vector<2x128xf32> to vector<2xf32>
    %40 = vector.shape_cast %39 : vector<2xf32> to vector<2x1xf32>
    %41 = vector.extract_strided_slice %34 {offsets = [0, 0, 0], sizes = [2, 1, 128], strides = [1, 1, 1]} : vector<2x16x128xf32> to vector<2x1x128xf32>
    %42 = vector.shape_cast %41 : vector<2x1x128xf32> to vector<2x128xf32>
    %c0_19 = arith.constant 0 : index
    %c0_20 = arith.constant 0 : index
    %43 = vector.load %arg7[%c0_19, %c0_20] : memref<1x128xf32, #tpu.memory_space<vmem>>, vector<1x128xf32>
    %44 = vector.broadcast %43 : vector<1x128xf32> to vector<2x128xf32>
    %45 = arith.mulf %42, %44 : vector<2x128xf32>
    %cst_21 = arith.constant dense<0.000000e+00> : vector<2xf32>
    %46 = vector.multi_reduction <add>, %45, %cst_21 [1] : vector<2x128xf32> to vector<2xf32>
    %47 = vector.shape_cast %46 : vector<2xf32> to vector<2x1xf32>
    %48 = arith.subf %40, %47 : vector<2x1xf32>
    %49 = vector.extract_strided_slice %34 {offsets = [0, 15, 0], sizes = [2, 1, 128], strides = [1, 1, 1]} : vector<2x16x128xf32> to vector<2x1x128xf32>
    %50 = vector.shape_cast %49 : vector<2x1x128xf32> to vector<2x128xf32>
    %c0_22 = arith.constant 0 : index
    %c0_23 = arith.constant 0 : index
    %51 = vector.load %arg8[%c0_22, %c0_23] : memref<1x128xf32, #tpu.memory_space<vmem>>, vector<1x128xf32>
    %52 = vector.broadcast %51 : vector<1x128xf32> to vector<2x128xf32>
    %53 = arith.mulf %50, %52 : vector<2x128xf32>
    %cst_24 = arith.constant dense<0.000000e+00> : vector<2xf32>
    %54 = vector.multi_reduction <add>, %53, %cst_24 [1] : vector<2x128xf32> to vector<2xf32>
    %55 = vector.shape_cast %54 : vector<2xf32> to vector<2x1xf32>
    %56 = arith.subf %48, %55 : vector<2x1xf32>
    %c0_25 = arith.constant 0 : index
    %c0_26 = arith.constant 0 : index
    %57 = vector.load %arg9[%c0_25, %c0_26] : memref<1x1xf32, #tpu.memory_space<vmem>>, vector<1x1xf32>
    %58 = vector.broadcast %57 : vector<1x1xf32> to vector<2x1xf32>
    %59 = arith.addf %56, %58 : vector<2x1xf32>
    %c0_27 = arith.constant 0 : index
    %c0_28 = arith.constant 0 : index
    %60 = vector.load %arg10[%c0_27, %c0_28] : memref<2x1xf32, #tpu.memory_space<vmem>>, vector<2x1xf32>
    tpu.vector_store %arg10[%c0_27, %c0_28], %59 {strides = array<i32>} : memref<2x1xf32, #tpu.memory_space<vmem>>, vector<2x1xf32>,
    return
  }
  func.func @transform_0(%arg0: i32) -> (i32, i32, i32) {
    %c0_i32 = arith.constant 0 : i32
    %c0_i32_0 = arith.constant 0 : i32
    %c0_i32_1 = arith.constant 0 : i32
    return %arg0, %c0_i32, %c0_i32_0 : i32, i32, i32
  }
  func.func @transform_1(%arg0: i32) -> (i32, i32) {
    %c0_i32 = arith.constant 0 : i32
    %c0_i32_0 = arith.constant 0 : i32
    %c0_i32_1 = arith.constant 0 : i32
    return %c0_i32, %c0_i32_0 : i32, i32
  }
  func.func @transform_2(%arg0: i32) -> (i32, i32) {
    %c0_i32 = arith.constant 0 : i32
    %c0_i32_0 = arith.constant 0 : i32
    %c0_i32_1 = arith.constant 0 : i32
    return %c0_i32, %c0_i32_0 : i32, i32
  }
  func.func @transform_3(%arg0: i32) -> (i32, i32) {
    %c0_i32 = arith.constant 0 : i32
    %c0_i32_0 = arith.constant 0 : i32
    %c0_i32_1 = arith.constant 0 : i32
    return %c0_i32, %c0_i32_0 : i32, i32
  }
  func.func @transform_4(%arg0: i32) -> (i32, i32) {
    %c0_i32 = arith.constant 0 : i32
    %c0_i32_0 = arith.constant 0 : i32
    %c0_i32_1 = arith.constant 0 : i32
    return %c0_i32, %c0_i32_0 : i32, i32
  }
  func.func @transform_5(%arg0: i32) -> (i32, i32) {
    %c0_i32 = arith.constant 0 : i32
    %c0_i32_0 = arith.constant 0 : i32
    %c0_i32_1 = arith.constant 0 : i32
    return %c0_i32, %c0_i32_0 : i32, i32
  }
  func.func @transform_6(%arg0: i32) -> (i32, i32) {
    %c0_i32 = arith.constant 0 : i32
    %c0_i32_0 = arith.constant 0 : i32
    %c0_i32_1 = arith.constant 0 : i32
    return %c0_i32, %c0_i32_0 : i32, i32
  }
  func.func @transform_7(%arg0: i32) -> (i32, i32) {
    %c0_i32 = arith.constant 0 : i32
    %c0_i32_0 = arith.constant 0 : i32
    %c0_i32_1 = arith.constant 0 : i32
    return %c0_i32, %c0_i32_0 : i32, i32
  }
  func.func @transform_8(%arg0: i32) -> (i32, i32) {
    %c0_i32 = arith.constant 0 : i32
    %c0_i32_0 = arith.constant 0 : i32
    %c0_i32_1 = arith.constant 0 : i32
    return %c0_i32, %c0_i32_0 : i32, i32
  }
  func.func @transform_9(%arg0: i32) -> (i32, i32) {
    %c0_i32 = arith.constant 0 : i32
    %c0_i32_0 = arith.constant 0 : i32
    return %arg0, %c0_i32 : i32, i32
  }
}

</mosaic_0001>

<bundles_post_ra>
// kernel: tpu_custom_call.1
= control target key start
LH: loop header
LB: loop body
LE: loop exit
PB: predicated region body
PF: predicated region fallthrough
CT: control target
= control target key end

     0   :  { %s947_s0 = inlined_call_operand.hbm [shape: f32[2,16,20], index: 0, kind: input, shape index: {}]   ;;  %s948_s1 = inlined_call_operand.hbm [shape: bf16[60,64], index: 1, kind: input, shape index: {}]   ;;  %s949_s2 = inlined_call_operand.vmem [shape: f32[1,64], index: 2, kind: input, shape index: {}]   ;;  %s950_s3 = inlined_call_operand.hbm [shape: bf16[192,128], index: 3, kind: input, shape index: {}]   ;;  %s951_s4 = inlined_call_operand.vmem [shape: f32[1,128], index: 4, kind: input, shape index: {}]   ;;  %s952_s5 = inlined_call_operand.vmem [shape: f32[1,128], index: 5, kind: input, shape index: {}]   ;;  %s953_s6 = inlined_call_operand.vmem [shape: f32[1,128], index: 6, kind: input, shape index: {}]   ;;  %s954_s7 = inlined_call_operand.vmem [shape: f32[1,128], index: 7, kind: input, shape index: {}]   ;;  %s955_s8 = inlined_call_operand.<no memory space> [shape: f32[1,1], index: 8, kind: input, shape index: {}]   ;;  %s956_s9 = inlined_call_operand.vmem [shape: f32[2,1], index: 9, kind: output, shape index: {}]  }
   0x1   :  { %v14_v0 = vstv %s955_s8 }
   0x2   :  { %15 = vst [vmem:[#allocation2] sm:$0x1] %v14_v0 }
   0x3   :  { %16 = vsyncpa [#allocation4], 0 }
   0x4   :  { %17 = vsyncpa [#allocation6], 0  ;;  %s769_s11 = smov [#allocation5]   ;;  %s699_s15 = scalar_lea.hbm %s948_s1, 512 }
   0x5   :  { %s35_s12 = sshll.u32 %s769_s11, 4  ;;  %p700_p0 = scmp.ne.s32.totalorder %s948_s1, %s699_s15  ;;  %s36_s12 = int_to_ptr.vmem [resolvable:$true] %s35_s12 }
   0x6   :  { %p703_p1 = scmp.lt.u32.totalorder %s699_s15, %s948_s1 }
   0x8   :  { %p705_p2 = pnand %p703_p1, %p700_p0 }
   0xa   :  { %708 = shalt.err (!%p705_p2)
}
   0xb   :  { %s709_s8 = scalar_lea.vmem %s36_s12, 512  ;;  %p714_p4 = scmp.lt.s32.totalorder %s36_s12, %s36_s12 }
   0xc   :  { %p710_p3 = scmp.ne.s32.totalorder %s36_s12, %s709_s8  ;;  %p715_p5 = scmp.lt.s32.totalorder %s709_s8, %s709_s8 }
   0xe   :  { %p716_p6 = por %p715_p5, %p714_p4 }
  0x10   :  { %p717_p7 = pnand %p716_p6, %p710_p3 }
  0x12   :  { %720 = shalt.err (!%p717_p7)
}
  0x13   :  { %s770_s20 = smov 64   ;;  %s771_s21 = smov 4  }
  0x14   :  { %41 = dma.hbm_to_vmem [thread:$0]  %s948_s1, 512, %s36_s12, [#allocation6], %s770_s20, %s770_s20, %s771_s21  }
  0x15   :  { %s772_s24 = smov [#allocation3]   ;;  %s721_s28 = scalar_lea.hbm %s947_s0, 512 }
  0x16   :  { %s23_s25 = sshll.u32 %s772_s24, 4  ;;  %p722_p8 = scmp.ne.s32.totalorder %s947_s0, %s721_s28  ;;  %s24_s25 = int_to_ptr.vmem [resolvable:$true] %s23_s25 }
  0x17   :  { %p725_p9 = scmp.lt.u32.totalorder %s721_s28, %s947_s0 }
  0x19   :  { %p727_p10 = pnand %p725_p9, %p722_p8 }
  0x1b   :  { %730 = shalt.err (!%p727_p10)
}
  0x1c   :  { %s731_s13 = scalar_lea.vmem %s24_s25, 512  ;;  %p736_p12 = scmp.lt.s32.totalorder %s24_s25, %s24_s25 }
  0x1d   :  { %p732_p11 = scmp.ne.s32.totalorder %s24_s25, %s731_s13  ;;  %p737_p13 = scmp.lt.s32.totalorder %s731_s13, %s731_s13 }
  0x1f   :  { %p738_p0 = por %p737_p13, %p736_p12 }
  0x21   :  { %p739_p1 = pnand %p738_p0, %p732_p11 }
  0x23   :  { %742 = shalt.err (!%p739_p1)
}
  0x24   :  { %s773_s1 = smov 128   ;;  %s774_s12 = smov 8  }
  0x25   :  { %29 = dma.hbm_to_vmem [thread:$0]  %s947_s0, 512, %s24_s25, [#allocation4], %s773_s1, %s773_s1, %s774_s12  }
  0x26   :  { %s775_s16 = smov [#allocation7]   ;;  %s743_s8 = scalar_lea.hbm %s950_s3, 1536 }
  0x27   :  { %s49_s17 = sshll.u32 %s775_s16, 4  ;;  %p744_p2 = scmp.ne.s32.totalorder %s950_s3, %s743_s8  ;;  %s50_s17 = int_to_ptr.vmem [resolvable:$true] %s49_s17 }
  0x28   :  { %p747_p3 = scmp.lt.u32.totalorder %s743_s8, %s950_s3 }
  0x2a   :  { %p749_p4 = pnand %p747_p3, %p744_p2 }
  0x2c   :  { %752 = shalt.err (!%p749_p4)
}
  0x2d   :  { %s753_s27 = scalar_lea.vmem %s50_s17, 1536  ;;  %p758_p6 = scmp.lt.s32.totalorder %s50_s17, %s50_s17 }
  0x2e   :  { %p754_p5 = scmp.ne.s32.totalorder %s50_s17, %s753_s27  ;;  %p759_p7 = scmp.lt.s32.totalorder %s753_s27, %s753_s27 }
  0x30   :  { %p760_p8 = por %p759_p7, %p758_p6 }
  0x32   :  { %p761_p9 = pnand %p760_p8, %p754_p5 }
  0x34   :  { %764 = shalt.err (!%p761_p9)
}
  0x35   :  { %55 = dma.hbm_to_vmem [thread:$0]  %s950_s3, 1536, %s50_s17, [#allocation6], %s770_s20, %s770_s20, %s771_s21  }
  0x36   :  { %765 = dma.done.wait [#allocation4], 512  }
  0x37   :  { %766 = vsyncadd [#allocation4], 4294966784 }
  0x38   :  { %767 = dma.done.wait [#allocation6], 2048  }
  0x39   :  { %768 = vsyncadd [#allocation6], 4294965248  ;;  %vm84_vm0 = vcmask 1040384   ;;  %v76_v1 = vld [vmem:[#allocation3] sm:$0xff]  ;;  %v77_v2 = vld [vmem:[#allocation3 + $0x8] sm:$0xff]  ;;  %vm105_vm1 = vcmask 1046528  }
  0x3a   :  { %vm128_vm2 = vcmask 1045504   ;;  %v78_v3 = vld [vmem:[#allocation3 + $0x10] sm:$0xff]  ;;  %v85_v4 = vrot.slane %v76_v1, 7  ;;  %v86_v5 = vrot.slane %v77_v2, 7  ;;  %v79_v6 = vld [vmem:[#allocation3 + $0x18] sm:$0xff]  ;;  %v683_v9 = vld [vmem:[#allocation5] sm:$0xff]  }
  0x3b   :  { %v88_v7 = vrot.slane %v78_v3, 7  ;;  %v89_v8 = vrot.slane %v79_v6, 7  ;;  %v684_v14 = vld [vmem:[#allocation5 + $0x8] sm:$0xff]   ;;  %630 = vmatprep.subr.bf16.mxu0 %v683_v9  ;;  %v685_v23 = vld [vmem:[#allocation5 + $0x10] sm:$0xff]   ;;  %v686_v32 = vld [vmem:[#allocation5 + $0x18] sm:$0x3f]  }
  0x3c   :  { %v87_v10 = vsel %vm84_vm0, %v85_v4, %v86_v5  ;;  %v97_v11 = vsel %vm84_vm0, 0.0, %v85_v4  ;;  %v99_v12 = vsel %vm84_vm0, %v86_v5, 0.0  ;;  %631 = vmatpush3.bf16.msra.mxu0 %v683_v9  ;;  %s776_s3 = smov 20   ;;  %v203_v39 = vsel %vm128_vm2, %v686_v32, 0  ;;  %s777_s21 = smov 40   ;;  %v687_v2 = vld [vmem:[#allocation7] sm:$0xff]  }
  0x3d   :  { %v878_v13 = vsel %vm84_vm0, 0.0, %v88_v7  ;;  %v106_v15 = vrot.slane %v97_v11, 1  ;;  %v107_v16 = vrot.slane %v87_v10, 1  ;;  %v109_v17 = vrot.slane %v99_v12, 1  ;;  %632 = vmatprep.subr.bf16.mxu0 %v684_v14  ;;  %v688_v4 = vld [vmem:[#allocation7 + $0x8] sm:$0xff]   ;;  %v689_v5 = vld [vmem:[#allocation7 + $0x10] sm:$0xff]  }
  0x3e   :  { %v129_v18 = vrot.slane %v97_v11, 2  ;;  %v130_v19 = vrot.slane %v87_v10, 2  ;;  %v132_v20 = vrot.slane %v99_v12, 2  ;;  %v90_v21 = vsel %vm84_vm0, %v88_v7, %v89_v8  ;;  %v690_v6 = vld [vmem:[#allocation7 + $0x18] sm:$0xff]   ;;  %v691_v7 = vld [vmem:[#allocation7 + $0x20] sm:$0xff]   ;;  %v693_v9 = vld [vmem:[#allocation7 + $0x30] sm:$0xff]  }
  0x3f   :  { %v100_v22 = vsel %vm84_vm0, %v89_v8, 0.0  ;;  %v108_v24 = vsel %vm105_vm1, %v106_v15, %v107_v16  ;;  %v110_v25 = vsel %vm105_vm1, %v107_v16, %v109_v17  ;;  %v111_v26 = vrot.slane %v878_v13, 1  ;;  %v692_v8 = vld [vmem:[#allocation7 + $0x28] sm:$0xff]  }
  0x40   :  { %v112_v27 = vrot.slane %v90_v21, 1  ;;  %v653_v28 = vpack.i.bf16 %v110_v25, %v108_v24  ;;  %v131_v29 = vsel %vm128_vm2, %v129_v18, %v130_v19  ;;  %v133_v30 = vsel %vm128_vm2, %v130_v19, %v132_v20  ;;  %633 = vmatpush3.bf16.msra.mxu0 %v684_v14  ;;  %v696_v12 = vld [vmem:[#allocation7 + $0x48] sm:$0xff]   ;;  %v604_v14 = vld [vmem:[%s949_s2] ss:$0 sm:$0xff] }
  0x41   :  { %v114_v31 = vrot.slane %v100_v22, 1  ;;  %v663_v33 = vpack.i.bf16 %v133_v30, %v131_v29  ;;  %v134_v35 = vrot.slane %v878_v13, 2  ;;  %v135_v36 = vrot.slane %v90_v21, 2  ;;  %634 = vmatprep.subr.bf16.mxu0 %v685_v23  ;;  %v698_v25 = vld [vmem:[#allocation7 + $0x58] sm:$0xff]  }
  0x42   :  { %v113_v34 = vsel %vm105_vm1, %v111_v26, %v112_v27  ;;  %654 = vrot.lane.b32.xlu0 %v653_v28, %s776_s3  ;;  %v137_v38 = vrot.slane %v100_v22, 2  ;;  %vm151_vm3 = vcmask 162816   ;;  %vm156_vm4 = vcmask 326656  }
  0x43   :  { %v115_v37 = vsel %vm105_vm1, %v112_v27, %v114_v31  ;;  %664 = vrot.lane.b32.xlu1 %v663_v33, %s777_s21  ;;  %v136_v41 = vsel %vm128_vm2, %v134_v35, %v135_v36  ;;  %vm195_vm5 = vcmask 490496   ;;  %v778_v3 = vmov 0  }
  0x44   :  { %v658_v40 = vpack.i.bf16 %v115_v37, %v113_v34  ;;  %v138_v42 = vsel %vm128_vm2, %v135_v36, %v137_v38  ;;  %635 = vmatpush3.bf16.msra.mxu0 %v685_v23  ;;  %440 = vmatprep.subr.bf16.mxu1 %v778_v3  ;;  %vm328_vm6 = vcmask 523264   ;;  %vm568_vm7 = vcmask 1047559  }
  0x45   :  { %v668_v43 = vpack.i.bf16 %v138_v42, %v136_v41  ;;  %642 = vmatprep.subr.msk.bf16.mxu0 %vm128_vm2, %v686_v32  ;;  %441 = vmatpush1.bf16.msra.mxu1 %v687_v2  ;;  %vm529_vm8 = vcmask 1041409   ;;  %vm532_vm9 = vcmask 1041408   ;;  %vm590_vm10 = vcmask 1024  }
  0x46   :  { %659 = vrot.lane.b32.xlu0 %v658_v40, %s776_s3  ;;  %442 = vmatprep.subr.bf16.mxu1 %v778_v3 }
  0x47   :  { %669 = vrot.lane.b32.xlu1 %v668_v43, %s777_s21 }
  0x48   :  { %637 = vmatpush3.bf16.msra.mxu0 %v203_v39 }
  0x49   :  { %443 = vmatpush1.bf16.msra.mxu1 %v688_v4 }
  0x4a   :  { %444 = vmatprep.subr.bf16.mxu1 %v778_v3 }
  0x4d   :  { %445 = vmatpush1.bf16.msra.mxu1 %v689_v5 }
  0x4e   :  { %446 = vmatprep.subr.bf16.mxu1 %v778_v3 }
  0x51   :  { %447 = vmatpush1.bf16.msra.mxu1 %v690_v6 }
  0x52   :  { %448 = vmatprep.subr.bf16.mxu1 %v778_v3 }
  0x55   :  { %449 = vmatpush1.bf16.msra.mxu1 %v691_v7 }
  0x56   :  { %450 = vmatprep.subr.bf16.mxu1 %v778_v3 }
  0x59   :  { %451 = vmatpush1.bf16.msra.mxu1 %v692_v8 }
  0x5a   :  { %452 = vmatprep.subr.bf16.mxu1 %v778_v3 }
  0x5d   :  { %453 = vmatpush1.bf16.msra.mxu1 %v693_v9 }
  0x5e   :  { %454 = vmatprep.subr.bf16.mxu1 %v778_v3 }
  0xb4   :  { %v655_v44 = vpop.permute.xlu0 %654 }
  0xb5   :  { %v657_v45 = vunpack.i.h.bf16 %v655_v44  ;;  %v656_v46 = vunpack.i.l.bf16 %v655_v44  ;;  %v665_v47 = vpop.permute.xlu1 %664 }
  0xb6   :  { %v667_v48 = vunpack.i.h.bf16 %v665_v47  ;;  %v666_v49 = vunpack.i.l.bf16 %v665_v47 }
  0xb7   :  { %v152_v50 = vsel %vm151_vm3, %v97_v11, %v656_v46  ;;  %v153_v51 = vsel %vm151_vm3, %v87_v10, %v657_v45  ;;  %v694_v10 = vld [vmem:[#allocation7 + $0x38] sm:$0xff]   ;;  %v695_v11 = vld [vmem:[#allocation7 + $0x40] sm:$0xff]  }
  0xb8   :  { %v660_v52 = vpop.permute.xlu0 %659  ;;  %v157_v53 = vsel %vm156_vm4, %v152_v50, %v666_v49  ;;  %v158_v54 = vsel %vm156_vm4, %v153_v51, %v667_v48  ;;  %455 = vmatpush1.bf16.msra.mxu1 %v694_v10  ;;  %v619_v10 = vld [vmem:[%s951_s4] ss:$0 sm:$0xff] }
  0xb9   :  { %v662_v55 = vunpack.i.h.bf16 %v660_v52  ;;  %v661_v56 = vunpack.i.l.bf16 %v660_v52  ;;  %v670_v57 = vpop.permute.xlu1 %669  ;;  %v170_v58 = vpack.c.bf16 %v158_v54, %v157_v53  ;;  %456 = vmatprep.subr.bf16.mxu1 %v778_v3 }
  0xba   :  { %v672_v59 = vunpack.i.h.bf16 %v670_v57  ;;  %v671_v60 = vunpack.i.l.bf16 %v670_v57 }
  0xbb   :  { %v155_v61 = vsel %vm151_vm3, %v90_v21, %v662_v55  ;;  %v154_v62 = vsel %vm151_vm3, %v878_v13, %v661_v56  ;;  %638 = vmatprep.mubr.msk.bf16.mxu0 %vm195_vm5, %v170_v58  ;;  %v697_v13 = vld [vmem:[#allocation7 + $0x50] sm:$0xff]  }
  0xbc   :  { %v159_v63 = vsel %vm156_vm4, %v154_v62, %v671_v60  ;;  %v160_v0 = vsel %vm156_vm4, %v155_v61, %v672_v59  ;;  %457 = vmatpush1.bf16.msra.mxu1 %v695_v11 }
  0xbd   :  { %v171_v1 = vpack.c.bf16 %v160_v0, %v159_v63  ;;  %458 = vmatprep.subr.bf16.mxu1 %v778_v3 }
  0xbf   :  { %639 = vmatmul.mubr.msk.bf16.vlgmr.msra.gmra.mrb[0].mxu0 %vm195_vm5, %v171_v1 }
  0xc0   :  { %459 = vmatpush1.bf16.msra.mxu1 %v696_v12 }
  0xc1   :  { %460 = vmatprep.subr.bf16.mxu1 %v778_v3 }
  0xc4   :  { %461 = vmatpush1.bf16.msra.mxu1 %v697_v13 }
  0xc5   :  { %462 = vmatprep.subr.bf16.mxu1 %v778_v3 }
  0xc8   :  { %463 = vmatpush1.bf16.msra.mxu1 %v698_v25 }
 0x192   :  { %v640_v15 = vpop.f32.mrb[0].mxu0 }
 0x193   :  { %v262_v16 = vadd.f32 %v640_v15, %v604_v14  ;;  %v239_v17 = vpop.f32.mrb[1].mxu0 }
 0x194   :  { %v260_v18 = vadd.f32 %v604_v14, %v239_v17  ;;  %v641_v19 = vpop.f32.mrb[2].mxu0  ;;  %v622_v17 = vld [vmem:[%s954_s7] ss:$0 sm:$0xff] }
 0x195   :  { %v266_v20 = vmax.f32 %v262_v16, 0.0  ;;  %v263_v21 = vadd.f32 %v641_v19, %v604_v14  ;;  %v242_v22 = vpop.f32.mrb[3].mxu0 }
 0x196   :  { %v264_v23 = vmax.f32 %v260_v18, 0.0  ;;  %v261_v24 = vadd.f32 %v604_v14, %v242_v22 }
 0x197   :  { %v275_v26 = vrot.slane %v266_v20, 7  ;;  %v267_v27 = vmax.f32 %v263_v21, 0.0 }
 0x198   :  { %v272_v28 = vrot.slane %v264_v23, 7  ;;  %v265_v29 = vmax.f32 %v261_v24, 0.0 }
 0x199   :  { %v285_v30 = vsel %vm84_vm0, 0.0, %v275_v26  ;;  %v276_v31 = vrot.slane %v267_v27, 7 }
 0x19a   :  { %v284_v32 = vsel %vm84_vm0, 0.0, %v272_v28  ;;  %v273_v33 = vrot.slane %v265_v29, 7  ;;  %v297_v34 = vrot.slane %v285_v30, 1  ;;  %v319_v58 = vrot.slane %v285_v30, 2 }
 0x19b   :  { %v277_v35 = vsel %vm84_vm0, %v275_v26, %v276_v31  ;;  %v287_v36 = vsel %vm84_vm0, %v276_v31, 0.0  ;;  %v292_v37 = vrot.slane %v284_v32, 1  ;;  %v314_v38 = vrot.slane %v284_v32, 2 }
 0x19c   :  { %v300_v39 = vrot.slane %v287_v36, 1  ;;  %v274_v40 = vsel %vm84_vm0, %v272_v28, %v273_v33  ;;  %v286_v41 = vsel %vm84_vm0, %v273_v33, 0.0  ;;  %v298_v42 = vrot.slane %v277_v35, 1  ;;  %v621_v28 = vld [vmem:[%s953_s6] ss:$0 sm:$0xff] }
 0x19d   :  { %v315_v43 = vrot.slane %v274_v40, 2  ;;  %v293_v44 = vrot.slane %v274_v40, 1  ;;  %v295_v45 = vrot.slane %v286_v41, 1  ;;  %v317_v46 = vrot.slane %v286_v41, 2 }
 0x19e   :  { %v299_v47 = vsel %vm105_vm1, %v297_v34, %v298_v42  ;;  %v301_v48 = vsel %vm105_vm1, %v298_v42, %v300_v39  ;;  %v320_v56 = vrot.slane %v277_v35, 2  ;;  %v322_v57 = vrot.slane %v287_v36, 2 }
 0x19f   :  { %v316_v49 = vsel %vm128_vm2, %v314_v38, %v315_v43  ;;  %v294_v50 = vsel %vm105_vm1, %v292_v37, %v293_v44  ;;  %v678_v51 = vpack.i.bf16 %v301_v48, %v299_v47  ;;  %v318_v52 = vsel %vm128_vm2, %v315_v43, %v317_v46 }
 0x1a0   :  { %v296_v53 = vsel %vm105_vm1, %v293_v44, %v295_v45  ;;  %v359_v54 = vpack.c.bf16 %v318_v52, %v316_v49  ;;  %v321_v63 = vsel %vm128_vm2, %v319_v58, %v320_v56  ;;  %v323_v0 = vsel %vm128_vm2, %v320_v56, %v322_v57  ;;  %v620_v52 = vld [vmem:[%s952_s5] ss:$0 sm:$0xff] }
 0x1a1   :  { %v673_v55 = vpack.i.bf16 %v296_v53, %v294_v50  ;;  %679 = vrot.lane.b32.xlu1 %v678_v51, %s770_s20  ;;  %v361_v6 = vpack.c.bf16 %v323_v0, %v321_v63 }
 0x1a2   :  { %617 = vmatprep.mubr.msk.bf16.mxu1 %vm328_vm6, %v359_v54 }
 0x1a3   :  { %674 = vrot.lane.b32.xlu0 %v673_v55, %s770_s20 }
 0x213   :  { %v680_v62 = vpop.permute.xlu1 %679 }
 0x214   :  { %v682_v4 = vunpack.i.h.bf16 %v680_v62  ;;  %v681_v5 = vunpack.i.l.bf16 %v680_v62 }
 0x215   :  { %v675_v59 = vpop.permute.xlu0 %674 }
 0x216   :  { %v677_v60 = vunpack.i.h.bf16 %v675_v59  ;;  %v676_v61 = vunpack.i.l.bf16 %v675_v59  ;;  %v331_v7 = vsel %vm328_vm6, %v285_v30, %v681_v5  ;;  %v332_v8 = vsel %vm328_vm6, %v277_v35, %v682_v4 }
 0x217   :  { %v360_v9 = vpack.c.bf16 %v332_v8, %v331_v7 }
 0x218   :  { %v329_v1 = vsel %vm328_vm6, %v284_v32, %v676_v61  ;;  %v330_v2 = vsel %vm328_vm6, %v274_v40, %v677_v60 }
 0x219   :  { %v358_v3 = vpack.c.bf16 %v330_v2, %v329_v1 }
 0x21b   :  { %473 = vmatmul.mubr.bf16.vlgmr.msra.gmra.mrb[0].mxu1 %v358_v3  ;;  %v623_v3 = vld [vmem:[#allocation2] ss:$0 sm:$0xff] }
 0x21c   :  { %618 = vmatprep.mubr.msk.bf16.mxu1 %vm328_vm6, %v361_v6 }
 0x223   :  { %481 = vmatmul.mubr.bf16.gmra.mrb[4].mxu1 %v360_v9 }
 0x2ee   :  { %v474_v11 = vpop.f32.mrb[0].mxu1 }
 0x2ef   :  { %v495_v12 = vadd.f32 %v619_v10, %v474_v11  ;;  %v476_v13 = vpop.f32.mrb[1].mxu1 }
 0x2f0   :  { %v477_v14 = vpop.f32.mrb[2].mxu1 }
 0x2f1   :  { %v496_v15 = vadd.f32 %v619_v10, %v477_v14  ;;  %v479_v16 = vpop.f32.mrb[3].mxu1  ;;  %v499_v18 = vmax.f32 %v495_v12, 0.0 }
 0x2f3   :  { %v500_v19 = vmax.f32 %v496_v15, 0.0  ;;  %v543_v35 = vmul.f32 %v621_v28, %v499_v18 }
 0x2f5   :  { %v503_v20 = vadd.f32 %v500_v19, %v499_v18  ;;  %v561_v21 = vmul.f32 %v622_v17, %v500_v19 }
 0x2f6   :  { %v482_v22 = vpop.f32.mrb[4].mxu1 }
 0x2f7   :  { %v504_v23 = vrot.slane %v503_v20, 4  ;;  %v497_v24 = vadd.f32 %v619_v10, %v482_v22  ;;  %v484_v25 = vpop.f32.mrb[5].mxu1  ;;  %v569_v26 = vsel %vm568_vm7, %v561_v21, 0.0 }
 0x2f8   :  { %570 = vadd.xlane.f32.xlu0 %v569_v26  ;;  %v485_v27 = vpop.f32.mrb[6].mxu1 }
 0x2f9   :  { %v505_v29 = vadd.f32 %v504_v23, %v503_v20  ;;  %v501_v30 = vmax.f32 %v497_v24, 0.0  ;;  %v498_v31 = vadd.f32 %v619_v10, %v485_v27  ;;  %v487_v32 = vpop.f32.mrb[7].mxu1 }
 0x2fb   :  { %v544_v33 = vmul.f32 %v621_v28, %v501_v30  ;;  %v502_v34 = vmax.f32 %v498_v31, 0.0  ;;  %v506_v36 = vrot.slane %v505_v29, 2 }
 0x2fd   :  { %v547_v37 = vrot.slane %v544_v33, 7  ;;  %v510_v38 = vadd.f32 %v502_v34, %v501_v30  ;;  %v562_v39 = vmul.f32 %v622_v17, %v502_v34  ;;  %v507_v43 = vadd.f32 %v506_v36, %v505_v29 }
 0x2ff   :  { %v511_v40 = vrot.slane %v510_v38, 4  ;;  %v565_v41 = vrot.slane %v562_v39, 7  ;;  %v548_v42 = vsel %vm529_vm8, %v547_v37, %v543_v35  ;;  %v508_v47 = vrot.slane %v507_v43, 1 }
 0x300   :  { %v550_v58 = vsel %vm532_vm9, %v548_v42, 0.0 }
 0x301   :  { %v512_v44 = vadd.f32 %v511_v40, %v510_v38  ;;  %v572_v45 = vsel %vm84_vm0, %v565_v41, 0.0  ;;  %v509_v50 = vadd.f32 %v508_v47, %v507_v43 }
 0x302   :  { %573 = vadd.xlane.f32.xlu1 %v572_v45 }
 0x303   :  { %v513_v46 = vrot.slane %v512_v44, 2  ;;  %v524_v54 = vmul.f32 %v620_v52, %v509_v50 }
 0x305   :  { %v514_v48 = vadd.f32 %v513_v46, %v512_v44 }
 0x307   :  { %v515_v49 = vrot.slane %v514_v48, 1 }
 0x309   :  { %v516_v51 = vadd.f32 %v515_v49, %v514_v48 }
 0x30b   :  { %v525_v53 = vmul.f32 %v620_v52, %v516_v51 }
 0x30d   :  { %v528_v55 = vrot.slane %v525_v53, 7 }
 0x30f   :  { %v530_v56 = vsel %vm529_vm8, %v528_v55, %v524_v54 }
 0x310   :  { %v533_v57 = vsel %vm532_vm9, %v530_v56, 0.0 }
 0x311   :  { %534 = vadd.xlane.f32.xlu0 %v533_v57 }
 0x315   :  { %551 = vadd.xlane.f32.xlu0 %v550_v58 }
 0x385   :  { %v571_v59 = vpop.xlane.xlu0 %570 }
 0x386   :  { %v577_v63 = vrot.slane %v571_v59, 7 }
 0x38f   :  { %v574_v60 = vpop.xlane.xlu1 %573 }
 0x390   :  { %v578_v62 = vrot.slane %v574_v60, 7 }
 0x392   :  { %v579_v2 = vsel %vm84_vm0, %v577_v63, %v578_v62 }
 0x39e   :  { %v535_v61 = vpop.xlane.xlu0 %534 }
 0x3a2   :  { %v552_v0 = vpop.xlane.xlu0 %551 }
 0x3a3   :  { %v553_v1 = vsub.f32 %v535_v61, %v552_v0 }
 0x3a5   :  { %v581_v4 = vsub.f32 %v553_v1, %v579_v2 }
 0x3a7   :  { %v589_v5 = vadd.f32 %v623_v3, %v581_v4 }
 0x3a9   :  { %591 = vst.msk [vmem:[%s956_s9] sm:$0x3] %vm590_vm10, %v589_v5 }
 0x3aa   :  { %596 = vsyncpa [#allocation4], 1 }
 0x3ab   :  { %597 = vsyncpa [#allocation6], 1 }

</bundles_post_ra>
